<compile_context>
chip_gen: v5e
topology: v5e:2x2
jax: 0.10.0
libtpu: 0.0.40
codegen_flags: <defaults>
</compile_context>

<pallas_src>
import numpy as np
import jax
import jax.numpy as jnp
from jax.experimental import pallas as pl
from jax.experimental.pallas import tpu as pltpu


# ----------------------------------------------------------------------------
# Glue: graph preprocessing (mirrors torch_rgcn utils exactly; numpy only)
# ----------------------------------------------------------------------------
def add_inverse_and_self(triples, num_nodes, num_rels):
    s, p, o = triples[:, 0], triples[:, 1], triples[:, 2]
    inverse = np.stack([o, p + num_rels, s], axis=1)
    nodes = np.arange(num_nodes, dtype=np.int64)
    self_loops = np.stack(
        [nodes, np.full(num_nodes, 2 * num_rels, dtype=np.int64), nodes], axis=1)
    return np.concatenate([triples, inverse, self_loops], axis=0)


def horizontal_adjacency(triples_plus, num_nodes, num_relations,
                         general_edge_count, self_edge_count):
    """Dense (N, R*N) horizontally-stacked, column-normalised adjacency."""
    fr = triples_plus[:, 0]
    to = triples_plus[:, 1] * num_nodes + triples_plus[:, 2]
    vals = np.ones(len(fr), dtype=np.float64)
    colsum = np.zeros(num_relations * num_nodes, dtype=np.float64)
    np.add.at(colsum, to, vals)
    sums = colsum[to]
    # rearrange (transpose-trick): swap sums of original and inverse edges
    n, i = general_edge_count, self_edge_count
    sums = np.concatenate([sums[n:2 * n], sums[:n], sums[-i:]], axis=0)
    vals = vals / sums
    A = np.zeros((num_nodes, num_relations * num_nodes), dtype=np.float32)
    np.add.at(A, (fr, to), vals.astype(np.float32))
    return A


def vertical_adjacency(triples_plus, num_nodes, num_relations):
    """Dense (R*N, N) vertically-stacked, row-normalised adjacency."""
    fr = triples_plus[:, 1] * num_nodes + triples_plus[:, 0]
    to = triples_plus[:, 2]
    vals = np.ones(len(fr), dtype=np.float64)
    rowsum = np.zeros(num_relations * num_nodes, dtype=np.float64)
    np.add.at(rowsum, fr, vals)
    sums = rowsum[fr]
    vals = vals / sums
    A = np.zeros((num_relations * num_nodes, num_nodes), dtype=np.float32)
    np.add.at(A, (fr, to), vals.astype(np.float32))
    return A


def _round_up(x, m):
    return ((x + m - 1) // m) * m


# ----------------------------------------------------------------------------
# Fused 2-layer R-GCN Pallas kernel (single launch, single grid step)
# ----------------------------------------------------------------------------
def fused_rgcn_kernel(ah_ref, av_ref, w1_ref, w2_ref, b1_ref, b2_ref, o_ref):
    """ah_ref : (N, R*N)      bf16   horizontally-stacked adjacency
       av_ref : (R, N, N)     bf16   per-relation vertical adjacency blocks
       w1_ref : (R*N, HP)     bf16   layer-1 weight, flattened + lane-padded
       w2_ref : (R, HP, CP)   bf16   layer-2 weight, lane-padded
       b1_ref : (1, HP) f32,  b2_ref : (1, CP) f32
       o_ref  : (N, CP)       f32    lane-dense padded logits"""
    R = av_ref.shape[0]

    # ---- Layer 1: one big K = R*N contraction, fused bias + ReLU ----------
    h = jnp.dot(ah_ref[...], w1_ref[...], preferred_element_type=jnp.float32)
    h = jnp.maximum(h + b1_ref[...], 0.0).astype(jnp.bfloat16)   # (N, HP)

    # ---- Layer 2 (reassociated): out = sum_r A_v[r] @ (H @ W2[r]) + b2 ----
    acc = None
    for r in range(R):                       # static unroll, no grid overhead
        p_r = jnp.dot(h, w2_ref[r],
                      preferred_element_type=jnp.float32).astype(jnp.bfloat16)
        contrib = jnp.dot(av_ref[r], p_r, preferred_element_type=jnp.float32)
        acc = contrib if acc is None else acc + contrib

    o_ref[...] = acc + b2_ref[...]


def node_classifier_forward(A_h, A_v_r, W1, b1, W2, b2):
    """A_h: (N, R*N) f32, A_v_r: (R, N, N) f32, W1: (R, N, nhid) f32,
       b1: (1, nhid), W2: (R, nhid, nclass), b2: (1, nclass).
       Returns (N, nclass) f32 logits."""
    N = A_h.shape[0]
    R = A_v_r.shape[0]
    nhid = W1.shape[-1]
    nclass = W2.shape[-1]
    RN = R * N
    HP = max(_round_up(nhid, 128), 128)      # lane-dense hidden width
    CP = max(_round_up(nclass, 128), 128)    # lane-dense output width

    # Layout plumbing (wrapper side): bf16 cast + zero-padding to 128 lanes.
    ah = A_h.astype(jnp.bfloat16)
    av = A_v_r.astype(jnp.bfloat16)
    w1 = jnp.zeros((RN, HP), jnp.bfloat16).at[:, :nhid].set(
        W1.reshape(RN, nhid).astype(jnp.bfloat16))
    w2 = jnp.zeros((R, HP, CP), jnp.bfloat16).at[:, :nhid, :nclass].set(
        W2.astype(jnp.bfloat16))
    b1p = jnp.zeros((1, HP), jnp.float32).at[:, :nhid].set(
        jnp.reshape(b1, (1, nhid)).astype(jnp.float32))
    b2p = jnp.zeros((1, CP), jnp.float32).at[:, :nclass].set(
        jnp.reshape(b2, (1, nclass)).astype(jnp.float32))

    out_pad = pl.pallas_call(
        fused_rgcn_kernel,
        out_shape=jax.ShapeDtypeStruct((N, CP), jnp.float32),
        grid=(1,),
        in_specs=[
            pl.BlockSpec((N, RN), lambda i: (0, 0)),
            pl.BlockSpec((R, N, N), lambda i: (0, 0, 0)),
            pl.BlockSpec((RN, HP), lambda i: (0, 0)),
            pl.BlockSpec((R, HP, CP), lambda i: (0, 0, 0)),
            pl.BlockSpec((1, HP), lambda i: (0, 0)),
            pl.BlockSpec((1, CP), lambda i: (0, 0)),
        ],
        out_specs=pl.BlockSpec((N, CP), lambda i: (0, 0)),
        compiler_params=pltpu.CompilerParams(
            dimension_semantics=("arbitrary",)),
    )(ah, av, w1, w2, b1p, b2p)

    return out_pad[:, :nclass]


# ----------------------------------------------------------------------------
# Pure-JAX reference (f32 compute from the same bf16-rounded inputs)
# ----------------------------------------------------------------------------
def reference_forward(A_h, A_v_r, W1, b1, W2, b2):
    R, _, nhid = W1.shape
    N = A_h.shape[0]
    ah = A_h.astype(jnp.bfloat16).astype(jnp.float32)
    av = A_v_r.astype(jnp.bfloat16).astype(jnp.float32)
    w1 = W1.astype(jnp.bfloat16).astype(jnp.float32)
    w2 = W2.astype(jnp.bfloat16).astype(jnp.float32)
    h = jnp.maximum(ah @ w1.reshape(R * N, nhid) + jnp.reshape(b1, (1, -1)), 0.0)
    af = jnp.einsum('rij,jk->rik', av, h)
    out = jnp.einsum('rio,rni->no', w2, af) + jnp.reshape(b2, (1, -1))
    return out


# ----------------------------------------------------------------------------
# Main
# ----------------------------------------------------------------------------
if __name__ == "__main__":
    # Small synthetic knowledge graph
    num_nodes = 32     # N
    num_rels = 3       # original relations
    nhid = 16
    nclass = 4
    num_edges = 80     # E (unique triples by construction)
    R = 2 * num_rels + 1  # relations after adding inverse + self-loop

    key = jax.random.PRNGKey(0)
    k_tri, k_w1, k_w2 = jax.random.split(key, 3)

    # deterministic unique triples (s, p, o)
    flat = jax.random.choice(k_tri, num_nodes * num_rels * num_nodes,
                             shape=(num_edges,), replace=False)
    flat = np.asarray(flat, dtype=np.int64)
    s = flat // (num_rels * num_nodes)
    p = (flat // num_nodes) % num_rels
    o = flat % num_nodes
    triples = np.stack([s, p, o], axis=1)

    triples_plus = add_inverse_and_self(triples, num_nodes, num_rels)
    general_edge_count = (triples_plus.shape[0] - num_nodes) // 2
    self_edge_count = num_nodes

    # Dense normalised adjacencies.
    A_h = jnp.asarray(horizontal_adjacency(
        triples_plus, num_nodes, R, general_edge_count, self_edge_count))
    A_v = vertical_adjacency(triples_plus, num_nodes, R)
    A_v_r = jnp.asarray(A_v.reshape(R, num_nodes, num_nodes))   # (R, N, N)

    # Parameters (deterministic init; featureless layer 1 => in_dim = num_nodes).
    # TODO(synk): torch_rgcn uses schlichtkrull-normal init; plain scaled normal
    # is used here since this is a synthetic-weight kernel, not a checkpoint.
    W1 = (jax.random.normal(k_w1, (R, num_nodes, nhid), jnp.float32)
          * (1.0 / np.sqrt(num_nodes)))
    W2 = (jax.random.normal(k_w2, (R, nhid, nclass), jnp.float32)
          * (1.0 / np.sqrt(nhid)))
    b1 = jnp.zeros((1, nhid), jnp.float32)    # bias is zero-initialised in the module
    b2 = jnp.zeros((1, nclass), jnp.float32)

    forward = jax.jit(node_classifier_forward)
    out = jax.block_until_ready(forward(A_h, A_v_r, W1, b1, W2, b2))

    ref = reference_forward(A_h, A_v_r, W1, b1, W2, b2)
    # bf16 inputs + bf16 intermediate rounding inside the kernel -> loose tol.
    np.testing.assert_allclose(np.asarray(out), np.asarray(ref),
                               rtol=2e-2, atol=2e-2)
    assert out.shape == (num_nodes, nclass)

    print("KERNEL_OK")
</pallas_src>

<mosaic_0001>
module attributes {stable_mosaic.version = 11 : i64} {
  func.func @fused_rgcn_kernel(%arg0: i32, %arg1: memref<32x224xbf16, #tpu.memory_space<vmem>>, %arg2: memref<7x32x32xbf16, #tpu.memory_space<vmem>>, %arg3: memref<224x128xbf16, #tpu.memory_space<vmem>>, %arg4: memref<7x128x128xbf16, #tpu.memory_space<vmem>>, %arg5: memref<1x128xf32, #tpu.memory_space<vmem>>, %arg6: memref<1x128xf32, #tpu.memory_space<vmem>>, %arg7: memref<32x128xf32, #tpu.memory_space<vmem>>) attributes {dimension_semantics = [#tpu.dimension_semantics<arbitrary>], iteration_bounds = array<i64: 1>, scalar_prefetch = 0 : i64, scratch_operands = 0 : i64, tpu.core_type = #tpu.core_type<tc>, window_params = [{pipeline_mode = #tpu.pipeline_mode<synchronous>, transform_indices = @transform_0, window_bounds = array<i64: 32, 224>}, {pipeline_mode = #tpu.pipeline_mode<synchronous>, transform_indices = @transform_1, window_bounds = array<i64: 7, 32, 32>}, {pipeline_mode = #tpu.pipeline_mode<synchronous>, transform_indices = @transform_2, window_bounds = array<i64: 224, 128>}, {pipeline_mode = #tpu.pipeline_mode<synchronous>, transform_indices = @transform_3, window_bounds = array<i64: 7, 128, 128>}, {pipeline_mode = #tpu.pipeline_mode<synchronous>, transform_indices = @transform_4, window_bounds = array<i64: 1, 128>}, {pipeline_mode = #tpu.pipeline_mode<synchronous>, transform_indices = @transform_5, window_bounds = array<i64: 1, 128>}, {pipeline_mode = #tpu.pipeline_mode<synchronous>, transform_indices = @transform_6, window_bounds = array<i64: 32, 128>}]} {
    %c0 = arith.constant 0 : index
    %c0_0 = arith.constant 0 : index
    %0 = vector.load %arg1[%c0, %c0_0] : memref<32x224xbf16, #tpu.memory_space<vmem>>, vector<32x224xbf16>
    %c0_1 = arith.constant 0 : index
    %c0_2 = arith.constant 0 : index
    %1 = vector.load %arg3[%c0_1, %c0_2] : memref<224x128xbf16, #tpu.memory_space<vmem>>, vector<224x128xbf16>
    %cst = arith.constant dense<0.000000e+00> : vector<32x128xf32>
    %2 = tpu.matmul %0, %1, %cst {dimension_numbers = #tpu.dot_dimension_numbers<[1], [0], [0], [1], [0, 0, 1, 1], [], []>} : vector<32x224xbf16>, vector<224x128xbf16>, vector<32x128xf32> -> vector<32x128xf32>
    %c0_3 = arith.constant 0 : index
    %c0_4 = arith.constant 0 : index
    %3 = vector.load %arg5[%c0_3, %c0_4] : memref<1x128xf32, #tpu.memory_space<vmem>>, vector<1x128xf32>
    %4 = vector.broadcast %3 : vector<1x128xf32> to vector<32x128xf32>
    %5 = arith.addf %2, %4 : vector<32x128xf32>
    %cst_5 = arith.constant 0.000000e+00 : f32
    %6 = vector.broadcast %cst_5 : f32 to vector<32x128xf32>
    %7 = arith.maximumf %5, %6 : vector<32x128xf32>
    %8 = arith.truncf %7 : vector<32x128xf32> to vector<32x128xbf16>
    %c0_6 = arith.constant 0 : index
    %c0_7 = arith.constant 0 : index
    %c0_8 = arith.constant 0 : index
    %9 = vector.load %arg4[%c0_6, %c0_7, %c0_8] : memref<7x128x128xbf16, #tpu.memory_space<vmem>>, vector<1x128x128xbf16>
    %10 = vector.shape_cast %9 : vector<1x128x128xbf16> to vector<128x128xbf16>
    %cst_9 = arith.constant dense<0.000000e+00> : vector<32x128xf32>
    %11 = tpu.matmul %8, %10, %cst_9 {dimension_numbers = #tpu.dot_dimension_numbers<[1], [0], [0], [1], [0, 0, 1, 1], [], []>} : vector<32x128xbf16>, vector<128x128xbf16>, vector<32x128xf32> -> vector<32x128xf32>
    %12 = arith.truncf %11 : vector<32x128xf32> to vector<32x128xbf16>
    %c0_10 = arith.constant 0 : index
    %c0_11 = arith.constant 0 : index
    %c0_12 = arith.constant 0 : index
    %13 = vector.load %arg2[%c0_10, %c0_11, %c0_12] : memref<7x32x32xbf16, #tpu.memory_space<vmem>>, vector<1x32x32xbf16>
    %14 = vector.shape_cast %13 : vector<1x32x32xbf16> to vector<32x32xbf16>
    %cst_13 = arith.constant dense<0.000000e+00> : vector<32x128xf32>
    %15 = tpu.matmul %14, %12, %cst_13 {dimension_numbers = #tpu.dot_dimension_numbers<[1], [0], [0], [1], [0, 0, 1, 1], [], []>} : vector<32x32xbf16>, vector<32x128xbf16>, vector<32x128xf32> -> vector<32x128xf32>
    %c1 = arith.constant 1 : index
    %c0_14 = arith.constant 0 : index
    %c0_15 = arith.constant 0 : index
    %16 = vector.load %arg4[%c1, %c0_14, %c0_15] : memref<7x128x128xbf16, #tpu.memory_space<vmem>>, vector<1x128x128xbf16>
    %17 = vector.shape_cast %16 : vector<1x128x128xbf16> to vector<128x128xbf16>
    %cst_16 = arith.constant dense<0.000000e+00> : vector<32x128xf32>
    %18 = tpu.matmul %8, %17, %cst_16 {dimension_numbers = #tpu.dot_dimension_numbers<[1], [0], [0], [1], [0, 0, 1, 1], [], []>} : vector<32x128xbf16>, vector<128x128xbf16>, vector<32x128xf32> -> vector<32x128xf32>
    %19 = arith.truncf %18 : vector<32x128xf32> to vector<32x128xbf16>
    %c1_17 = arith.constant 1 : index
    %c0_18 = arith.constant 0 : index
    %c0_19 = arith.constant 0 : index
    %20 = vector.load %arg2[%c1_17, %c0_18, %c0_19] : memref<7x32x32xbf16, #tpu.memory_space<vmem>>, vector<1x32x32xbf16>
    %21 = vector.shape_cast %20 : vector<1x32x32xbf16> to vector<32x32xbf16>
    %cst_20 = arith.constant dense<0.000000e+00> : vector<32x128xf32>
    %22 = tpu.matmul %21, %19, %cst_20 {dimension_numbers = #tpu.dot_dimension_numbers<[1], [0], [0], [1], [0, 0, 1, 1], [], []>} : vector<32x32xbf16>, vector<32x128xbf16>, vector<32x128xf32> -> vector<32x128xf32>
    %23 = arith.addf %15, %22 : vector<32x128xf32>
    %c2 = arith.constant 2 : index
    %c0_21 = arith.constant 0 : index
    %c0_22 = arith.constant 0 : index
    %24 = vector.load %arg4[%c2, %c0_21, %c0_22] : memref<7x128x128xbf16, #tpu.memory_space<vmem>>, vector<1x128x128xbf16>
    %25 = vector.shape_cast %24 : vector<1x128x128xbf16> to vector<128x128xbf16>
    %cst_23 = arith.constant dense<0.000000e+00> : vector<32x128xf32>
    %26 = tpu.matmul %8, %25, %cst_23 {dimension_numbers = #tpu.dot_dimension_numbers<[1], [0], [0], [1], [0, 0, 1, 1], [], []>} : vector<32x128xbf16>, vector<128x128xbf16>, vector<32x128xf32> -> vector<32x128xf32>
    %27 = arith.truncf %26 : vector<32x128xf32> to vector<32x128xbf16>
    %c2_24 = arith.constant 2 : index
    %c0_25 = arith.constant 0 : index
    %c0_26 = arith.constant 0 : index
    %28 = vector.load %arg2[%c2_24, %c0_25, %c0_26] : memref<7x32x32xbf16, #tpu.memory_space<vmem>>, vector<1x32x32xbf16>
    %29 = vector.shape_cast %28 : vector<1x32x32xbf16> to vector<32x32xbf16>
    %cst_27 = arith.constant dense<0.000000e+00> : vector<32x128xf32>
    %30 = tpu.matmul %29, %27, %cst_27 {dimension_numbers = #tpu.dot_dimension_numbers<[1], [0], [0], [1], [0, 0, 1, 1], [], []>} : vector<32x32xbf16>, vector<32x128xbf16>, vector<32x128xf32> -> vector<32x128xf32>
    %31 = arith.addf %23, %30 : vector<32x128xf32>
    %c3 = arith.constant 3 : index
    %c0_28 = arith.constant 0 : index
    %c0_29 = arith.constant 0 : index
    %32 = vector.load %arg4[%c3, %c0_28, %c0_29] : memref<7x128x128xbf16, #tpu.memory_space<vmem>>, vector<1x128x128xbf16>
    %33 = vector.shape_cast %32 : vector<1x128x128xbf16> to vector<128x128xbf16>
    %cst_30 = arith.constant dense<0.000000e+00> : vector<32x128xf32>
    %34 = tpu.matmul %8, %33, %cst_30 {dimension_numbers = #tpu.dot_dimension_numbers<[1], [0], [0], [1], [0, 0, 1, 1], [], []>} : vector<32x128xbf16>, vector<128x128xbf16>, vector<32x128xf32> -> vector<32x128xf32>
    %35 = arith.truncf %34 : vector<32x128xf32> to vector<32x128xbf16>
    %c3_31 = arith.constant 3 : index
    %c0_32 = arith.constant 0 : index
    %c0_33 = arith.constant 0 : index
    %36 = vector.load %arg2[%c3_31, %c0_32, %c0_33] : memref<7x32x32xbf16, #tpu.memory_space<vmem>>, vector<1x32x32xbf16>
    %37 = vector.shape_cast %36 : vector<1x32x32xbf16> to vector<32x32xbf16>
    %cst_34 = arith.constant dense<0.000000e+00> : vector<32x128xf32>
    %38 = tpu.matmul %37, %35, %cst_34 {dimension_numbers = #tpu.dot_dimension_numbers<[1], [0], [0], [1], [0, 0, 1, 1], [], []>} : vector<32x32xbf16>, vector<32x128xbf16>, vector<32x128xf32> -> vector<32x128xf32>
    %39 = arith.addf %31, %38 : vector<32x128xf32>
    %c4 = arith.constant 4 : index
    %c0_35 = arith.constant 0 : index
    %c0_36 = arith.constant 0 : index
    %40 = vector.load %arg4[%c4, %c0_35, %c0_36] : memref<7x128x128xbf16, #tpu.memory_space<vmem>>, vector<1x128x128xbf16>
    %41 = vector.shape_cast %40 : vector<1x128x128xbf16> to vector<128x128xbf16>
    %cst_37 = arith.constant dense<0.000000e+00> : vector<32x128xf32>
    %42 = tpu.matmul %8, %41, %cst_37 {dimension_numbers = #tpu.dot_dimension_numbers<[1], [0], [0], [1], [0, 0, 1, 1], [], []>} : vector<32x128xbf16>, vector<128x128xbf16>, vector<32x128xf32> -> vector<32x128xf32>
    %43 = arith.truncf %42 : vector<32x128xf32> to vector<32x128xbf16>
    %c4_38 = arith.constant 4 : index
    %c0_39 = arith.constant 0 : index
    %c0_40 = arith.constant 0 : index
    %44 = vector.load %arg2[%c4_38, %c0_39, %c0_40] : memref<7x32x32xbf16, #tpu.memory_space<vmem>>, vector<1x32x32xbf16>
    %45 = vector.shape_cast %44 : vector<1x32x32xbf16> to vector<32x32xbf16>
    %cst_41 = arith.constant dense<0.000000e+00> : vector<32x128xf32>
    %46 = tpu.matmul %45, %43, %cst_41 {dimension_numbers = #tpu.dot_dimension_numbers<[1], [0], [0], [1], [0, 0, 1, 1], [], []>} : vector<32x32xbf16>, vector<32x128xbf16>, vector<32x128xf32> -> vector<32x128xf32>
    %47 = arith.addf %39, %46 : vector<32x128xf32>
    %c5 = arith.constant 5 : index
    %c0_42 = arith.constant 0 : index
    %c0_43 = arith.constant 0 : index
    %48 = vector.load %arg4[%c5, %c0_42, %c0_43] : memref<7x128x128xbf16, #tpu.memory_space<vmem>>, vector<1x128x128xbf16>
    %49 = vector.shape_cast %48 : vector<1x128x128xbf16> to vector<128x128xbf16>
    %cst_44 = arith.constant dense<0.000000e+00> : vector<32x128xf32>
    %50 = tpu.matmul %8, %49, %cst_44 {dimension_numbers = #tpu.dot_dimension_numbers<[1], [0], [0], [1], [0, 0, 1, 1], [], []>} : vector<32x128xbf16>, vector<128x128xbf16>, vector<32x128xf32> -> vector<32x128xf32>
    %51 = arith.truncf %50 : vector<32x128xf32> to vector<32x128xbf16>
    %c5_45 = arith.constant 5 : index
    %c0_46 = arith.constant 0 : index
    %c0_47 = arith.constant 0 : index
    %52 = vector.load %arg2[%c5_45, %c0_46, %c0_47] : memref<7x32x32xbf16, #tpu.memory_space<vmem>>, vector<1x32x32xbf16>
    %53 = vector.shape_cast %52 : vector<1x32x32xbf16> to vector<32x32xbf16>
    %cst_48 = arith.constant dense<0.000000e+00> : vector<32x128xf32>
    %54 = tpu.matmul %53, %51, %cst_48 {dimension_numbers = #tpu.dot_dimension_numbers<[1], [0], [0], [1], [0, 0, 1, 1], [], []>} : vector<32x32xbf16>, vector<32x128xbf16>, vector<32x128xf32> -> vector<32x128xf32>
    %55 = arith.addf %47, %54 : vector<32x128xf32>
    %c6 = arith.constant 6 : index
    %c0_49 = arith.constant 0 : index
    %c0_50 = arith.constant 0 : index
    %56 = vector.load %arg4[%c6, %c0_49, %c0_50] : memref<7x128x128xbf16, #tpu.memory_space<vmem>>, vector<1x128x128xbf16>
    %57 = vector.shape_cast %56 : vector<1x128x128xbf16> to vector<128x128xbf16>
    %cst_51 = arith.constant dense<0.000000e+00> : vector<32x128xf32>
    %58 = tpu.matmul %8, %57, %cst_51 {dimension_numbers = #tpu.dot_dimension_numbers<[1], [0], [0], [1], [0, 0, 1, 1], [], []>} : vector<32x128xbf16>, vector<128x128xbf16>, vector<32x128xf32> -> vector<32x128xf32>
    %59 = arith.truncf %58 : vector<32x128xf32> to vector<32x128xbf16>
    %c6_52 = arith.constant 6 : index
    %c0_53 = arith.constant 0 : index
    %c0_54 = arith.constant 0 : index
    %60 = vector.load %arg2[%c6_52, %c0_53, %c0_54] : memref<7x32x32xbf16, #tpu.memory_space<vmem>>, vector<1x32x32xbf16>
    %61 = vector.shape_cast %60 : vector<1x32x32xbf16> to vector<32x32xbf16>
    %cst_55 = arith.constant dense<0.000000e+00> : vector<32x128xf32>
    %62 = tpu.matmul %61, %59, %cst_55 {dimension_numbers = #tpu.dot_dimension_numbers<[1], [0], [0], [1], [0, 0, 1, 1], [], []>} : vector<32x32xbf16>, vector<32x128xbf16>, vector<32x128xf32> -> vector<32x128xf32>
    %63 = arith.addf %55, %62 : vector<32x128xf32>
    %c0_56 = arith.constant 0 : index
    %c0_57 = arith.constant 0 : index
    %64 = vector.load %arg6[%c0_56, %c0_57] : memref<1x128xf32, #tpu.memory_space<vmem>>, vector<1x128xf32>
    %65 = vector.broadcast %64 : vector<1x128xf32> to vector<32x128xf32>
    %66 = arith.addf %63, %65 : vector<32x128xf32>
    %c0_58 = arith.constant 0 : index
    %c0_59 = arith.constant 0 : index
    %67 = vector.load %arg7[%c0_58, %c0_59] : memref<32x128xf32, #tpu.memory_space<vmem>>, vector<32x128xf32>
    tpu.vector_store %arg7[%c0_58, %c0_59], %66 {strides = array<i32>} : memref<32x128xf32, #tpu.memory_space<vmem>>, vector<32x128xf32>,
    return
  }
  func.func @transform_0(%arg0: i32) -> (i32, i32) {
    %c0_i32 = arith.constant 0 : i32
    %c0_i32_0 = arith.constant 0 : i32
    %c0_i32_1 = arith.constant 0 : i32
    return %c0_i32, %c0_i32_0 : i32, i32
  }
  func.func @transform_1(%arg0: i32) -> (i32, i32, i32) {
    %c0_i32 = arith.constant 0 : i32
    %c0_i32_0 = arith.constant 0 : i32
    %c0_i32_1 = arith.constant 0 : i32
    %c0_i32_2 = arith.constant 0 : i32
    return %c0_i32, %c0_i32_0, %c0_i32_1 : i32, i32, i32
  }
  func.func @transform_2(%arg0: i32) -> (i32, i32) {
    %c0_i32 = arith.constant 0 : i32
    %c0_i32_0 = arith.constant 0 : i32
    %c0_i32_1 = arith.constant 0 : i32
    return %c0_i32, %c0_i32_0 : i32, i32
  }
  func.func @transform_3(%arg0: i32) -> (i32, i32, i32) {
    %c0_i32 = arith.constant 0 : i32
    %c0_i32_0 = arith.constant 0 : i32
    %c0_i32_1 = arith.constant 0 : i32
    %c0_i32_2 = arith.constant 0 : i32
    return %c0_i32, %c0_i32_0, %c0_i32_1 : i32, i32, i32
  }
  func.func @transform_4(%arg0: i32) -> (i32, i32) {
    %c0_i32 = arith.constant 0 : i32
    %c0_i32_0 = arith.constant 0 : i32
    %c0_i32_1 = arith.constant 0 : i32
    return %c0_i32, %c0_i32_0 : i32, i32
  }
  func.func @transform_5(%arg0: i32) -> (i32, i32) {
    %c0_i32 = arith.constant 0 : i32
    %c0_i32_0 = arith.constant 0 : i32
    %c0_i32_1 = arith.constant 0 : i32
    return %c0_i32, %c0_i32_0 : i32, i32
  }
  func.func @transform_6(%arg0: i32) -> (i32, i32) {
    %c0_i32 = arith.constant 0 : i32
    %c0_i32_0 = arith.constant 0 : i32
    %c0_i32_1 = arith.constant 0 : i32
    return %c0_i32, %c0_i32_0 : i32, i32
  }
}

</mosaic_0001>

<bundles_post_ra>
// kernel: node_classifier_forward.1
= control target key start
LH: loop header
LB: loop body
LE: loop exit
PB: predicated region body
PF: predicated region fallthrough
CT: control target
= control target key end

     0   :  { %vm162_vm0 = vcmask 785408   ;;  %vm403_vm1 = vcmask 261120   ;;  %s2075_s2 = inlined_call_operand.vmem [shape: bf16[224,128], index: 2, kind: input, shape index: {}]   ;;  %s2076_s3 = inlined_call_operand.vmem [shape: bf16[7,128,128], index: 3, kind: input, shape index: {}]   ;;  %s2077_s0 = inlined_call_operand.vmem [shape: bf16[32,224], index: 0, kind: input, shape index: {}]   ;;  %s2078_s4 = inlined_call_operand.vmem [shape: f32[1,128], index: 4, kind: input, shape index: {}]   ;;  %s2079_s1 = inlined_call_operand.vmem [shape: bf16[7,32,32], index: 1, kind: input, shape index: {}]   ;;  %s2080_s5 = inlined_call_operand.vmem [shape: f32[1,128], index: 5, kind: input, shape index: {}]   ;;  %s2081_s6 = inlined_call_operand.vmem [shape: f32[32,128], index: 6, kind: output, shape index: {}]  }
   0x1   :  { %v1629_v0 = vld [vmem:[%s2075_s2 + $0x38] sm:$0xff]  ;;  %v1635_v1 = vld [vmem:[%s2075_s2 + $0x68] sm:$0xff]  ;;  %v1628_v2 = vld [vmem:[%s2075_s2 + $0x30] sm:$0xff] }
   0x2   :  { %169 = vmatpush.bf16.msra.mxu0 %v1629_v0  ;;  %190 = vmatpush.bf16.msra.mxu1 %v1635_v1  ;;  %v1634_v3 = vld [vmem:[%s2075_s2 + $0x60] sm:$0xff]  ;;  %v1627_v4 = vld [vmem:[%s2075_s2 + $0x28] sm:$0xff]  ;;  %v1633_v5 = vld [vmem:[%s2075_s2 + $0x58] sm:$0xff] }
   0x3   :  { %v1626_v6 = vld [vmem:[%s2075_s2 + $0x20] sm:$0xff]  ;;  %v1632_v7 = vld [vmem:[%s2075_s2 + $0x50] sm:$0xff]  ;;  %v1625_v8 = vld [vmem:[%s2075_s2 + $0x18] sm:$0xff] }
   0x4   :  { %v1631_v9 = vld [vmem:[%s2075_s2 + $0x48] sm:$0xff]  ;;  %v1624_v10 = vld [vmem:[%s2075_s2 + $0x10] sm:$0xff]  ;;  %v1643_v11 = vld [vmem:[%s2076_s3 + $0x38] sm:$0xff] }
   0x5   :  { %v1653_v12 = vld [vmem:[%s2076_s3 + $0x78] sm:$0xff]  ;;  %v1630_v13 = vld [vmem:[%s2075_s2 + $0x40] sm:$0xff]  ;;  %v1134_v15 = vld [vmem:[%s2077_s0 + $0x8] sm:$0xf0]  ;;  %277 = vmatpush.bf16.msra.mxu2 %v1643_v11 }
   0x6   :  { %170 = vmatpush.bf16.msra.mxu0 %v1628_v2  ;;  %191 = vmatpush.bf16.msra.mxu1 %v1634_v3  ;;  %v1618_v14 = vld [vmem:[%s2077_s0 + $0x4] sm:$0xf]  ;;  %v1642_v16 = vld [vmem:[%s2076_s3 + $0x30] sm:$0xff]  ;;  %v1623_v19 = vld [vmem:[%s2075_s2 + $0x8] sm:$0xff] }
   0x7   :  { %367 = vmatpush.bf16.msra.mxu3 %v1653_v12  ;;  %v1652_v17 = vld [vmem:[%s2076_s3 + $0x70] sm:$0xff]  ;;  %v1137_v18 = vor.u32 %v1618_v14, %v1134_v15  ;;  %v1622_v20 = vld [vmem:[%s2075_s2] sm:$0xff]  ;;  %v1619_v22 = vld [vmem:[%s2077_s0 + $0x4] sm:$0xf0] }
   0x8   :  { %v1132_v21 = vld [vmem:[%s2077_s0] sm:$0xf]  ;;  %v1620_v24 = vld [vmem:[%s2077_s0 + $0x14] sm:$0xf]  ;;  %v1142_v25 = vld [vmem:[%s2077_s0 + $0x18] sm:$0xf0] }
   0x9   :  { %278 = vmatpush.bf16.msra.mxu2 %v1642_v16  ;;  %v1133_v23 = vor.u32 %v1619_v22, %v1132_v21  ;;  %v1145_v26 = vor.u32 %v1620_v24, %v1142_v25  ;;  %v1140_v27 = vld [vmem:[%s2077_s0 + $0x10] sm:$0xf]  ;;  %v1621_v28 = vld [vmem:[%s2077_s0 + $0x14] sm:$0xf0]  ;;  %v1641_v30 = vld [vmem:[%s2076_s3 + $0x28] sm:$0xff] }
   0xa   :  { %171 = vmatpush.bf16.msra.mxu0 %v1627_v4  ;;  %192 = vmatpush.bf16.msra.mxu1 %v1633_v5  ;;  %v1141_v29 = vor.u32 %v1621_v28, %v1140_v27  ;;  %v1651_v31 = vld [vmem:[%s2076_s3 + $0x68] sm:$0xff]  ;;  %v1640_v32 = vld [vmem:[%s2076_s3 + $0x20] sm:$0xff]  ;;  %v1639_v34 = vld [vmem:[%s2076_s3 + $0x18] sm:$0xff] }
   0xb   :  { %368 = vmatpush.bf16.msra.mxu3 %v1652_v17  ;;  %v1650_v33 = vld [vmem:[%s2076_s3 + $0x60] sm:$0xff]  ;;  %v1649_v35 = vld [vmem:[%s2076_s3 + $0x58] sm:$0xff]  ;;  %v1638_v36 = vld [vmem:[%s2076_s3 + $0x10] sm:$0xff] }
   0xc   :  { %v1648_v37 = vld [vmem:[%s2076_s3 + $0x50] sm:$0xff]  ;;  %v1637_v38 = vld [vmem:[%s2076_s3 + $0x8] sm:$0xff]  ;;  %v1636_v40 = vld [vmem:[%s2076_s3] sm:$0xff] }
   0xd   :  { %279 = vmatpush.bf16.msra.mxu2 %v1641_v30  ;;  %v1647_v39 = vld [vmem:[%s2076_s3 + $0x48] sm:$0xff]  ;;  %v1646_v41 = vld [vmem:[%s2076_s3 + $0x40] sm:$0xff]  ;;  %v1663_v42 = vld [vmem:[%s2076_s3 + $0xb8] sm:$0xff] }
   0xe   :  { %172 = vmatpush.bf16.msra.mxu0 %v1626_v6  ;;  %193 = vmatpush.bf16.msra.mxu1 %v1632_v7  ;;  %v1662_v43 = vld [vmem:[%s2076_s3 + $0xb0] sm:$0xff]  ;;  %v1661_v44 = vld [vmem:[%s2076_s3 + $0xa8] sm:$0xff]  ;;  %v1660_v46 = vld [vmem:[%s2076_s3 + $0xa0] sm:$0xff] }
   0xf   :  { %369 = vmatpush.bf16.msra.mxu3 %v1651_v31  ;;  %v1659_v48 = vld [vmem:[%s2076_s3 + $0x98] sm:$0xff]  ;;  %v1706_v49 = vld [vmem:[%s2078_s4] ss:$0 sm:$0xff]  ;;  %v1658_v50 = vld [vmem:[%s2076_s3 + $0x90] sm:$0xff] }
  0x10   :  { %v1657_v53 = vld [vmem:[%s2076_s3 + $0x88] sm:$0xff]  ;;  %v1656_v57 = vld [vmem:[%s2076_s3 + $0x80] sm:$0xff]  ;;  %v1683_v0 = vld [vmem:[%s2076_s3 + $0x138] sm:$0xff] }
  0x11   :  { %280 = vmatpush.bf16.msra.mxu2 %v1640_v32  ;;  %v1682_v1 = vld [vmem:[%s2076_s3 + $0x130] sm:$0xff]  ;;  %v1681_v3 = vld [vmem:[%s2076_s3 + $0x128] sm:$0xff]  ;;  %v1676_v16 = vld [vmem:[%s2076_s3 + $0x100] sm:$0xff] }
  0x12   :  { %173 = vmatpush.bf16.msra.mxu0 %v1625_v8  ;;  %194 = vmatpush.bf16.msra.mxu1 %v1631_v9  ;;  %v1680_v8 = vld [vmem:[%s2076_s3 + $0x120] sm:$0xff]  ;;  %v1678_v14 = vld [vmem:[%s2076_s3 + $0x110] sm:$0xff]  ;;  %v1677_v15 = vld [vmem:[%s2076_s3 + $0x108] sm:$0xff] }
  0x13   :  { %370 = vmatpush.bf16.msra.mxu3 %v1650_v33  ;;  %v1703_v17 = vld [vmem:[%s2076_s3 + $0x1b8] sm:$0xff]  ;;  %v1698_v22 = vld [vmem:[%s2076_s3 + $0x190] sm:$0xff]  ;;  %v1696_v24 = vld [vmem:[%s2076_s3 + $0x180] sm:$0xff] }
  0x14   :  { %v1699_v21 = vld [vmem:[%s2076_s3 + $0x198] sm:$0xff] }
  0x15   :  { %281 = vmatpush.bf16.msra.mxu2 %v1639_v34 }
  0x16   :  { %174 = vmatpush.bf16.msra.mxu0 %v1624_v10  ;;  %195 = vmatpush.bf16.msra.mxu1 %v1630_v13  ;;  %v1679_v13 = vld [vmem:[%s2076_s3 + $0x118] sm:$0xff] }
  0x17   :  { %371 = vmatpush.bf16.msra.mxu3 %v1649_v35  ;;  %v1673_v35 = vld [vmem:[%s2076_s3 + $0xf8] sm:$0xff] }
  0x19   :  { %1202 = vmatmul.msk.bf16.vlgmr.msra.gmra.mxu1 %vm162_vm0, %v1137_v18  ;;  %282 = vmatpush.bf16.msra.mxu2 %v1638_v36  ;;  %v1702_v18 = vld [vmem:[%s2076_s3 + $0x1b0] sm:$0xff] }
  0x1a   :  { %175 = vmatpush.bf16.msra.mxu0 %v1623_v19  ;;  %v1701_v19 = vld [vmem:[%s2076_s3 + $0x1a8] sm:$0xff] }
  0x1b   :  { %372 = vmatpush.bf16.msra.mxu3 %v1648_v37 }
  0x1d   :  { %283 = vmatpush.bf16.msra.mxu2 %v1637_v38  ;;  %v1654_v38 = vld [vmem:[%s2079_s1 + $0x10] sm:$0xff] }
  0x1e   :  { %176 = vmatpush.bf16.msra.mxu0 %v1622_v20  ;;  %v1700_v20 = vld [vmem:[%s2076_s3 + $0x1a0] sm:$0xff] }
  0x1f   :  { %373 = vmatpush.bf16.msra.mxu3 %v1647_v39  ;;  %v1644_v39 = vld [vmem:[%s2079_s1] sm:$0xff] }
  0x21   :  { %177 = vmatmul.bf16.vlgmr.msra.gmra.mxu0 %v1133_v23  ;;  %284 = vmatpush.bf16.msra.mxu2 %v1636_v40  ;;  %v1697_v23 = vld [vmem:[%s2076_s3 + $0x188] sm:$0xff] }
  0x23   :  { %374 = vmatpush.bf16.msra.mxu3 %v1646_v41  ;;  %v1672_v41 = vld [vmem:[%s2076_s3 + $0xf0] sm:$0xff] }
  0x25   :  { %529 = vmatpush.bf16.msrb.mxu2 %v1663_v42  ;;  %v1671_v42 = vld [vmem:[%s2076_s3 + $0xe8] sm:$0xff] }
  0x29   :  { %1203 = vmatmul.msk.bf16.gmra.mxu1 %vm162_vm0, %v1145_v26  ;;  %530 = vmatpush.bf16.msrb.mxu2 %v1662_v43 }
  0x2d   :  { %531 = vmatpush.bf16.msrb.mxu2 %v1661_v44  ;;  %v1670_v44 = vld [vmem:[%s2076_s3 + $0xe0] sm:$0xff] }
  0x31   :  { %182 = vmatmul.bf16.gmra.mxu0 %v1141_v29  ;;  %532 = vmatpush.bf16.msrb.mxu2 %v1660_v46  ;;  %v1655_v46 = vld [vmem:[%s2079_s1 + $0x18] sm:$0xff] }
  0x35   :  { %533 = vmatpush.bf16.msrb.mxu2 %v1659_v48 }
  0x39   :  { %534 = vmatpush.bf16.msrb.mxu2 %v1658_v50  ;;  %v1667_v50 = vld [vmem:[%s2076_s3 + $0xc8] sm:$0xff] }
  0x3d   :  { %535 = vmatpush.bf16.msrb.mxu2 %v1657_v53 }
  0x41   :  { %536 = vmatpush.bf16.msrb.mxu2 %v1656_v57  ;;  %v1664_v57 = vld [vmem:[%s2079_s1 + $0x20] sm:$0xff] }
  0x96   :  { %v197_v45 = vpop.f32.mrf.mxu1 }
  0x9e   :  { %v178_v47 = vpop.f32.mrf.mxu0  ;;  %v199_v52 = vpop.f32.mrf.mxu1 }
  0x9f   :  { %v179_v51 = vadd.f32 %v1706_v49, %v178_v47  ;;  %v1645_v47 = vld [vmem:[%s2079_s1 + $0x8] sm:$0xff] }
  0xa1   :  { %v198_v55 = vadd.f32 %v197_v45, %v179_v51  ;;  %v1669_v45 = vld [vmem:[%s2076_s3 + $0xd8] sm:$0xff] }
  0xa3   :  { %v207_v59 = vmax.f32 %v198_v55, 0.0 }
  0xa6   :  { %v180_v54 = vpop.f32.mrf.mxu0  ;;  %v202_v62 = vpop.f32.mrf.mxu1 }
  0xa7   :  { %v181_v56 = vadd.f32 %v1706_v49, %v180_v54  ;;  %v1693_v54 = vld [vmem:[%s2076_s3 + $0x178] sm:$0xff] }
  0xa9   :  { %v200_v58 = vadd.f32 %v199_v52, %v181_v56  ;;  %v1666_v52 = vld [vmem:[%s2076_s3 + $0xc0] sm:$0xff]  ;;  %v1692_v56 = vld [vmem:[%s2076_s3 + $0x170] sm:$0xff] }
  0xab   :  { %v208_v60 = vmax.f32 %v200_v58, 0.0 }
  0xad   :  { %v1884_v61 = vpack.c.bf16 %v208_v60, %v207_v59  ;;  %v1691_v59 = vld [vmem:[%s2076_s3 + $0x168] sm:$0xff]  ;;  %v1690_v60 = vld [vmem:[%s2076_s3 + $0x160] sm:$0xff] }
  0xae   :  { %v183_v63 = vpop.f32.mrf.mxu0  ;;  %v204_v7 = vpop.f32.mrf.mxu1 }
  0xaf   :  { %285 = vmatmul.bf16.vlgmr.msra.gmra.mxu2 %v1884_v61  ;;  %375 = vmatmul.bf16.vlgmr.msra.gmra.mxu3 %v1884_v61  ;;  %v184_v2 = vadd.f32 %v1706_v49, %v183_v63  ;;  %v1689_v63 = vld [vmem:[%s2076_s3 + $0x158] sm:$0xff] }
  0xb0   :  { %789 = vmatpush.bf16.msra.mxu2 %v1683_v0  ;;  %v1688_v0 = vld [vmem:[%s2076_s3 + $0x150] sm:$0xff] }
  0xb1   :  { %v203_v5 = vadd.f32 %v202_v62, %v184_v2 }
  0xb3   :  { %v209_v10 = vmax.f32 %v203_v5, 0.0 }
  0xb4   :  { %790 = vmatpush.bf16.msra.mxu2 %v1682_v1  ;;  %v1665_v1 = vld [vmem:[%s2079_s1 + $0x28] sm:$0xff] }
  0xb6   :  { %v185_v4 = vpop.f32.mrf.mxu0 }
  0xb7   :  { %v186_v6 = vadd.f32 %v1706_v49, %v185_v4  ;;  %v1668_v49 = vld [vmem:[%s2076_s3 + $0xd0] sm:$0xff]  ;;  %v1686_v4 = vld [vmem:[%s2076_s3 + $0x140] sm:$0xff] }
  0xb8   :  { %791 = vmatpush.bf16.msra.mxu2 %v1681_v3  ;;  %v1687_v3 = vld [vmem:[%s2076_s3 + $0x148] sm:$0xff] }
  0xb9   :  { %v205_v9 = vadd.f32 %v204_v7, %v186_v6 }
  0xbb   :  { %v210_v11 = vmax.f32 %v205_v9, 0.0 }
  0xbc   :  { %792 = vmatpush.bf16.msra.mxu2 %v1680_v8 }
  0xbd   :  { %v1900_v12 = vpack.c.bf16 %v210_v11, %v209_v10 }
  0xbf   :  { %290 = vmatmul.bf16.gmra.mxu2 %v1900_v12  ;;  %380 = vmatmul.bf16.gmra.mxu3 %v1900_v12 }
  0xc0   :  { %793 = vmatpush.bf16.msra.mxu2 %v1679_v13 }
  0xc4   :  { %794 = vmatpush.bf16.msra.mxu2 %v1678_v14 }
  0xc8   :  { %795 = vmatpush.bf16.msra.mxu2 %v1677_v15 }
  0xcc   :  { %796 = vmatpush.bf16.msra.mxu2 %v1676_v16 }
  0xcf   :  { %537 = vmatmul.bf16.vlgmr.msrb.gmra.mxu2 %v1884_v61 }
  0xd0   :  { %1049 = vmatpush.bf16.msrb.mxu2 %v1703_v17 }
  0xd4   :  { %1050 = vmatpush.bf16.msrb.mxu2 %v1702_v18  ;;  %v1684_v18 = vld [vmem:[%s2079_s1 + $0x40] sm:$0xff] }
  0xd8   :  { %1051 = vmatpush.bf16.msrb.mxu2 %v1701_v19 }
  0xdc   :  { %1052 = vmatpush.bf16.msrb.mxu2 %v1700_v20 }
  0xdf   :  { %542 = vmatmul.bf16.gmra.mxu2 %v1900_v12 }
  0xe0   :  { %1053 = vmatpush.bf16.msrb.mxu2 %v1699_v21 }
  0xe4   :  { %1054 = vmatpush.bf16.msrb.mxu2 %v1698_v22  ;;  %v1704_v22 = vld [vmem:[%s2079_s1 + $0x60] sm:$0xff] }
  0xe8   :  { %1055 = vmatpush.bf16.msrb.mxu2 %v1697_v23 }
  0xec   :  { %1056 = vmatpush.bf16.msrb.mxu2 %v1696_v24 }
  0xef   :  { %797 = vmatmul.bf16.vlgmr.msra.gmra.mxu2 %v1884_v61 }
  0xff   :  { %802 = vmatmul.bf16.gmra.mxu2 %v1900_v12 }
 0x10f   :  { %1057 = vmatmul.bf16.vlgmr.msrb.gmra.mxu2 %v1884_v61 }
 0x11f   :  { %1062 = vmatmul.bf16.gmra.mxu2 %v1900_v12 }
 0x132   :  { %v286_v25 = vpop.f32.mrf.mxu2  ;;  %v376_v26 = vpop.f32.mrf.mxu3 }
 0x13a   :  { %v288_v27 = vpop.f32.mrf.mxu2  ;;  %v378_v28 = vpop.f32.mrf.mxu3 }
 0x13b   :  { %v296_v36 = vpack.c.bf16 %v288_v27, %v286_v25  ;;  %v386_v37 = vpack.c.bf16 %v378_v28, %v376_v26  ;;  %v1674_v26 = vld [vmem:[%s2079_s1 + $0x30] sm:$0xff]  ;;  %v1705_v28 = vld [vmem:[%s2079_s1 + $0x68] sm:$0xff] }
 0x142   :  { %v291_v29 = vpop.f32.mrf.mxu2  ;;  %v381_v30 = vpop.f32.mrf.mxu3 }
 0x14a   :  { %v293_v31 = vpop.f32.mrf.mxu2  ;;  %v383_v32 = vpop.f32.mrf.mxu3 }
 0x14b   :  { %v297_v33 = vpack.c.bf16 %v293_v31, %v291_v29  ;;  %v387_v34 = vpack.c.bf16 %v383_v32, %v381_v30  ;;  %v1675_v30 = vld [vmem:[%s2079_s1 + $0x38] sm:$0xff] }
 0x14d   :  { %416 = vmatpush.bf16.msrb.mxu1 %v387_v34  ;;  %451 = vmatpush.bf16.msrb.mxu0 %v297_v33 }
 0x151   :  { %417 = vmatpush.bf16.msrb.mxu1 %v386_v37  ;;  %452 = vmatpush.bf16.msrb.mxu0 %v296_v36  ;;  %v1695_v36 = vld [vmem:[%s2079_s1 + $0x58] sm:$0xff] }
 0x152   :  { %v538_v40 = vpop.f32.mrf.mxu2 }
 0x154   :  { %1296 = vmatmul.msk.bf16.vlgmr.msrb.gmra.mxu1 %vm403_vm1, %v1654_v38  ;;  %1306 = vmatmul.msk.bf16.vlgmr.msrb.gmra.mxu0 %vm403_vm1, %v1644_v39 }
 0x155   :  { %659 = vmatpush.bf16.msra.mxu1 %v1673_v35  ;;  %v1694_v35 = vld [vmem:[%s2079_s1 + $0x50] sm:$0xff] }
 0x159   :  { %660 = vmatpush.bf16.msra.mxu1 %v1672_v41 }
 0x15a   :  { %v540_v43 = vpop.f32.mrf.mxu2 }
 0x15b   :  { %v548_v55 = vpack.c.bf16 %v540_v43, %v538_v40 }
 0x15d   :  { %661 = vmatpush.bf16.msra.mxu1 %v1671_v42 }
 0x161   :  { %662 = vmatpush.bf16.msra.mxu1 %v1670_v44 }
 0x162   :  { %v543_v48 = vpop.f32.mrf.mxu2 }
 0x164   :  { %1297 = vmatmul.msk.bf16.gmra.mxu1 %vm403_vm1, %v1655_v46  ;;  %1307 = vmatmul.msk.bf16.gmra.mxu0 %vm403_vm1, %v1645_v47 }
 0x165   :  { %663 = vmatpush.bf16.msra.mxu1 %v1669_v45 }
 0x169   :  { %664 = vmatpush.bf16.msra.mxu1 %v1668_v49 }
 0x16a   :  { %v545_v51 = vpop.f32.mrf.mxu2 }
 0x16b   :  { %v549_v53 = vpack.c.bf16 %v545_v51, %v543_v48 }
 0x16d   :  { %665 = vmatpush.bf16.msra.mxu1 %v1667_v50  ;;  %577 = vmatpush.bf16.msrb.mxu3 %v549_v53 }
 0x171   :  { %666 = vmatpush.bf16.msra.mxu1 %v1666_v52  ;;  %578 = vmatpush.bf16.msrb.mxu3 %v548_v55 }
 0x172   :  { %v798_v58 = vpop.f32.mrf.mxu2 }
 0x174   :  { %1368 = vmatmul.msk.bf16.vlgmr.msrb.gmra.mxu3 %vm403_vm1, %v1664_v57  ;;  %667 = vmatmul.bf16.vlgmr.msra.gmra.mxu1 %v1884_v61 }
 0x175   :  { %919 = vmatpush.bf16.msrb.mxu1 %v1693_v54 }
 0x179   :  { %920 = vmatpush.bf16.msrb.mxu1 %v1692_v56 }
 0x17a   :  { %v800_v62 = vpop.f32.mrf.mxu2 }
 0x17b   :  { %v808_v7 = vpack.c.bf16 %v800_v62, %v798_v58 }
 0x17d   :  { %921 = vmatpush.bf16.msrb.mxu1 %v1691_v59 }
 0x181   :  { %922 = vmatpush.bf16.msrb.mxu1 %v1690_v60 }
 0x182   :  { %v803_v2 = vpop.f32.mrf.mxu2 }
 0x184   :  { %1369 = vmatmul.msk.bf16.gmra.mxu3 %vm403_vm1, %v1665_v1  ;;  %672 = vmatmul.bf16.gmra.mxu1 %v1900_v12 }
 0x185   :  { %923 = vmatpush.bf16.msrb.mxu1 %v1689_v63  ;;  %v1707_v63 = vld [vmem:[%s2080_s5] ss:$0 sm:$0xff] }
 0x189   :  { %924 = vmatpush.bf16.msrb.mxu1 %v1688_v0 }
 0x18a   :  { %v805_v5 = vpop.f32.mrf.mxu2 }
 0x18b   :  { %v809_v6 = vpack.c.bf16 %v805_v5, %v803_v2 }
 0x18d   :  { %925 = vmatpush.bf16.msrb.mxu1 %v1687_v3  ;;  %837 = vmatpush.bf16.msra.mxu3 %v809_v6 }
 0x191   :  { %926 = vmatpush.bf16.msrb.mxu1 %v1686_v4  ;;  %838 = vmatpush.bf16.msra.mxu3 %v808_v7 }
 0x192   :  { %v1058_v8 = vpop.f32.mrf.mxu2 }
 0x194   :  { %927 = vmatmul.bf16.vlgmr.msrb.gmra.mxu1 %v1884_v61  ;;  %1492 = vmatmul.msk.bf16.vlgmr.msra.gmra.mxu3 %vm403_vm1, %v1684_v18 }
 0x19a   :  { %v1060_v9 = vpop.f32.mrf.mxu2 }
 0x19b   :  { %v1068_v14 = vpack.c.bf16 %v1060_v9, %v1058_v8 }
 0x1a2   :  { %v1063_v10 = vpop.f32.mrf.mxu2 }
 0x1a4   :  { %932 = vmatmul.bf16.gmra.mxu1 %v1900_v12  ;;  %v1685_v12 = vld [vmem:[%s2079_s1 + $0x48] sm:$0xff] }
 0x1a5   :  { %1493 = vmatmul.msk.bf16.gmra.mxu3 %vm403_vm1, %v1685_v12 }
 0x1aa   :  { %v1065_v11 = vpop.f32.mrf.mxu2 }
 0x1ab   :  { %v1069_v13 = vpack.c.bf16 %v1065_v11, %v1063_v10 }
 0x1ad   :  { %1097 = vmatpush.bf16.msrb.mxu3 %v1069_v13 }
 0x1b1   :  { %1098 = vmatpush.bf16.msrb.mxu3 %v1068_v14 }
 0x1b5   :  { %1616 = vmatmul.msk.bf16.vlgmr.msrb.gmra.mxu3 %vm403_vm1, %v1704_v22 }
 0x1c5   :  { %1617 = vmatmul.msk.bf16.gmra.mxu3 %vm403_vm1, %v1705_v28 }
 0x1d1   :  { %v419_v15 = vpop.f32.mrf.mxu1  ;;  %v454_v39 = vpop.f32.mrf.mxu0 }
 0x1d2   :  { %v455_v52 = vadd.f32 %v454_v39, %v419_v15 }
 0x1d9   :  { %v421_v16 = vpop.f32.mrf.mxu1  ;;  %v456_v41 = vpop.f32.mrf.mxu0 }
 0x1da   :  { %v457_v57 = vadd.f32 %v456_v41, %v421_v16 }
 0x1e1   :  { %v2022_v17 = vpop.f32.mrf.mxu1  ;;  %v459_v43 = vpop.f32.mrf.mxu0 }
 0x1e2   :  { %v460_v4 = vadd.f32 %v459_v43, %v2022_v17 }
 0x1e9   :  { %v2028_v61 = vpop.f32.mrf.mxu1  ;;  %v461_v45 = vpop.f32.mrf.mxu0 }
 0x1ea   :  { %v462_v13 = vadd.f32 %v461_v45, %v2028_v61 }
 0x1f1   :  { %v668_v19 = vpop.f32.mrf.mxu1 }
 0x1f7   :  { %v580_v37 = vpop.f32.mrf.mxu3 }
 0x1f8   :  { %v590_v54 = vadd.f32 %v580_v37, %v455_v52 }
 0x1f9   :  { %v670_v20 = vpop.f32.mrf.mxu1 }
 0x1fa   :  { %v678_v25 = vpack.c.bf16 %v670_v20, %v668_v19 }
 0x1ff   :  { %v582_v38 = vpop.f32.mrf.mxu3 }
 0x200   :  { %v591_v60 = vadd.f32 %v582_v38, %v457_v57 }
 0x201   :  { %v673_v21 = vpop.f32.mrf.mxu1 }
 0x207   :  { %v585_v40 = vpop.f32.mrf.mxu3 }
 0x208   :  { %v592_v7 = vadd.f32 %v585_v40, %v460_v4 }
 0x209   :  { %v675_v23 = vpop.f32.mrf.mxu1 }
 0x20a   :  { %v679_v24 = vpack.c.bf16 %v675_v23, %v673_v21 }
 0x20c   :  { %707 = vmatpush.bf16.msra.mxu0 %v679_v24 }
 0x20f   :  { %v587_v42 = vpop.f32.mrf.mxu3 }
 0x210   :  { %708 = vmatpush.bf16.msra.mxu0 %v678_v25  ;;  %v593_v17 = vadd.f32 %v587_v42, %v462_v13 }
 0x211   :  { %v928_v27 = vpop.f32.mrf.mxu1 }
 0x213   :  { %1430 = vmatmul.msk.bf16.vlgmr.msra.gmra.mxu0 %vm403_vm1, %v1674_v26 }
 0x217   :  { %v840_v44 = vpop.f32.mrf.mxu3 }
 0x219   :  { %v930_v29 = vpop.f32.mrf.mxu1 }
 0x21a   :  { %v938_v34 = vpack.c.bf16 %v930_v29, %v928_v27 }
 0x21f   :  { %v842_v46 = vpop.f32.mrf.mxu3 }
 0x221   :  { %v933_v31 = vpop.f32.mrf.mxu1 }
 0x223   :  { %1431 = vmatmul.msk.bf16.gmra.mxu0 %vm403_vm1, %v1675_v30 }
 0x228   :  { %v845_v49 = vpop.f32.mrf.mxu3 }
 0x229   :  { %v935_v32 = vpop.f32.mrf.mxu1 }
 0x22a   :  { %v939_v33 = vpack.c.bf16 %v935_v32, %v933_v31 }
 0x22c   :  { %967 = vmatpush.bf16.msrb.mxu0 %v939_v33 }
 0x230   :  { %968 = vmatpush.bf16.msrb.mxu0 %v938_v34  ;;  %v847_v51 = vpop.f32.mrf.mxu3 }
 0x233   :  { %1554 = vmatmul.msk.bf16.vlgmr.msrb.gmra.mxu0 %vm403_vm1, %v1694_v35 }
 0x238   :  { %v1100_v56 = vpop.f32.mrf.mxu3 }
 0x240   :  { %v1102_v3 = vpop.f32.mrf.mxu3 }
 0x243   :  { %1555 = vmatmul.msk.bf16.gmra.mxu0 %vm403_vm1, %v1695_v36 }
 0x248   :  { %v1105_v16 = vpop.f32.mrf.mxu3 }
 0x250   :  { %v1107_v61 = vpop.f32.mrf.mxu3 }
 0x290   :  { %v710_v47 = vpop.f32.mrf.mxu0 }
 0x291   :  { %v720_v55 = vadd.f32 %v710_v47, %v590_v54 }
 0x293   :  { %v850_v58 = vadd.f32 %v840_v44, %v720_v55 }
 0x298   :  { %v712_v48 = vpop.f32.mrf.mxu0 }
 0x299   :  { %v721_v0 = vadd.f32 %v712_v48, %v591_v60 }
 0x29b   :  { %v851_v5 = vadd.f32 %v842_v46, %v721_v0 }
 0x2a0   :  { %v715_v50 = vpop.f32.mrf.mxu0 }
 0x2a1   :  { %v722_v9 = vadd.f32 %v715_v50, %v592_v7 }
 0x2a3   :  { %v852_v14 = vadd.f32 %v845_v49, %v722_v9 }
 0x2a8   :  { %v717_v53 = vpop.f32.mrf.mxu0 }
 0x2a9   :  { %v723_v19 = vadd.f32 %v717_v53, %v593_v17 }
 0x2ab   :  { %v853_v21 = vadd.f32 %v847_v51, %v723_v19 }
 0x2b0   :  { %v970_v59 = vpop.f32.mrf.mxu0 }
 0x2b1   :  { %v980_v62 = vadd.f32 %v970_v59, %v850_v58 }
 0x2b3   :  { %v1110_v1 = vadd.f32 %v1100_v56, %v980_v62 }
 0x2b5   :  { %v1118_v2 = vadd.f32 %v1707_v63, %v1110_v1 }
 0x2b7   :  { %1122 = vst [vmem:[%s2081_s6] sm:$0xff] %v1118_v2 }
 0x2b8   :  { %v972_v6 = vpop.f32.mrf.mxu0 }
 0x2b9   :  { %v981_v8 = vadd.f32 %v972_v6, %v851_v5 }
 0x2bb   :  { %v1111_v10 = vadd.f32 %v1102_v3, %v981_v8 }
 0x2bd   :  { %v1119_v11 = vadd.f32 %v1707_v63, %v1111_v10 }
 0x2bf   :  { %1123 = vst [vmem:[%s2081_s6 + $0x8] sm:$0xff] %v1119_v11 }
 0x2c0   :  { %v975_v15 = vpop.f32.mrf.mxu0 }
 0x2c1   :  { %v982_v18 = vadd.f32 %v975_v15, %v852_v14 }
 0x2c3   :  { %v1112_v12 = vadd.f32 %v1105_v16, %v982_v18 }
 0x2c5   :  { %v1120_v20 = vadd.f32 %v1707_v63, %v1112_v12 }
 0x2c7   :  { %1124 = vst [vmem:[%s2081_s6 + $0x10] sm:$0xff] %v1120_v20 }
 0x2c8   :  { %v977_v22 = vpop.f32.mrf.mxu0 }
 0x2c9   :  { %v983_v23 = vadd.f32 %v977_v22, %v853_v21 }
 0x2cb   :  { %v1113_v24 = vadd.f32 %v1107_v61, %v983_v23 }
 0x2cd   :  { %v1121_v25 = vadd.f32 %v1707_v63, %v1113_v24 }
 0x2cf   :  { %1125 = vst [vmem:[%s2081_s6 + $0x18] sm:$0xff] %v1121_v25 }

</bundles_post_ra>
